<compile_context>
chip_gen: v7x
topology: tpu7x:2x2x1
jax: 0.10.0
libtpu: 0.0.40
codegen_flags: <defaults>
</compile_context>

<pallas_src>
import functools

import numpy as np
import jax
import jax.numpy as jnp
from jax.experimental import pallas as pl
from jax.experimental.pallas import tpu as pltpu


def _round_up(x, m):
    return (x + m - 1) // m * m


def _pick_tile(padded_dim, unit, max_tile):
    """Largest multiple of `unit` that divides `padded_dim` and is <= max_tile."""
    best = unit
    t = unit
    while t <= min(padded_dim, max_tile):
        if padded_dim % t == 0:
            best = t
        t += unit
    return best


def _onehot_fill_kernel(yidx_ref, out_ref, *, tile_v):
    # yidx_ref: (1, TG, 1)  int32   target vocab index per graph row (sublane-major)
    # out_ref : (1, TG, TV) out_dtype  filled with -1, except +1 at the target index
    vi = pl.program_id(2)
    v0 = vi * tile_v                      # global vocab offset of this vocab tile
    tgt = yidx_ref[...]                   # (1, TG, 1)
    local = tgt - v0                      # target index local to this vocab tile
    iota = jax.lax.broadcasted_iota(jnp.int32, out_ref.shape, 2)
    match = jnp.logical_and(iota == local, tgt >= 0)
    one = jnp.array(1, out_ref.dtype)
    neg = jnp.array(-1, out_ref.dtype)
    out_ref[...] = jnp.where(match, one, neg)


def most_perfect_forward(y_idx, num_vocab, *, out_dtype=jnp.int32,
                         max_tile_g=256, max_tile_v=1024, force_pallas=None):
    """y_idx: (max_seq_len, num_graphs) int32, -1 where graph has no token.

    Returns a stacked array of shape (max_seq_len, num_graphs, num_vocab);
    result[j] is PyTorch's pred_list[j] (-1 everywhere, +1 at the target idx).
    """
    S, G = y_idx.shape
    itemsize = jnp.dtype(out_dtype).itemsize

    # Tiny problems: pallas_call launch / per-step overhead dwarfs the work,
    # and G << 8 wastes most sublanes.  Use a plain XLA expression instead.
    total_bytes = S * G * num_vocab * itemsize
    use_pallas = (total_bytes >= 64 * 1024) if force_pallas is None else force_pallas
    if not use_pallas:
        vocab_iota = jnp.arange(num_vocab, dtype=jnp.int32)[None, None, :]
        tgt = y_idx.astype(jnp.int32)[:, :, None]
        match = jnp.logical_and(vocab_iota == tgt, tgt >= 0)
        return jnp.where(match, jnp.array(1, out_dtype), jnp.array(-1, out_dtype))

    # Lane-dense, sublane-aligned tiling.  unit_g keeps the sublane dim a
    # multiple of the packed-dtype tile (8 for int32, 32 for int8).
    unit_g = max(8, 32 // itemsize)
    g_pad = _round_up(G, unit_g)
    v_pad = _round_up(num_vocab, 128)
    tg = _pick_tile(g_pad, unit_g, max_tile_g)
    tv = _pick_tile(v_pad, 128, max_tile_v)
    n_gt = g_pad // tg
    n_vt = v_pad // tv

    # Pad graph rows with -1 (NOT 0) so padded rows come out as all -1 and are
    # harmlessly sliced off below.
    y_pad = jnp.full((S, g_pad, 1), -1, dtype=jnp.int32)
    y_pad = y_pad.at[:, :G, 0].set(y_idx.astype(jnp.int32))

    kernel = functools.partial(_onehot_fill_kernel, tile_v=tv)
    out_padded = pl.pallas_call(
        kernel,
        out_shape=jax.ShapeDtypeStruct((S, g_pad, v_pad), out_dtype),
        grid=(S, n_gt, n_vt),
        in_specs=[
            # Tiny sublane-major block; its block index does not depend on the
            # innermost vocab-tile axis, so it stays resident across the vocab
            # sweep (re-DMA only when (s, g-tile) changes).
            pl.BlockSpec((1, tg, 1), lambda s, gi, vi: (s, gi, 0)),
        ],
        out_specs=pl.BlockSpec((1, tg, tv), lambda s, gi, vi: (s, gi, vi)),
        compiler_params=pltpu.CompilerParams(
            # Every (s, gi, vi) writes a disjoint output block -> all parallel;
            # gives v7x's two TensorCores plenty of work even when S is small.
            dimension_semantics=("parallel", "parallel", "parallel"),
            vmem_limit_bytes=32 * 1024 * 1024,  # tiles are ~1 MiB; fits v7x 64 MiB easily
        ),
    )(y_pad)

    if g_pad != G or v_pad != num_vocab:
        out_padded = out_padded[:, :G, :num_vocab]
    return out_padded


def tokens_to_idx(y_tokens, vocab2idx, max_seq_len):
    """Python glue mirroring the per-graph dict-lookup loop of the module."""
    num_graphs = len(y_tokens)
    arr = np.full((max_seq_len, num_graphs), -1, dtype=np.int32)
    for i, toks in enumerate(y_tokens):
        mapped = [vocab2idx[t] for t in toks if t in vocab2idx]
        for j in range(min(max_seq_len, len(mapped))):
            arr[j, i] = mapped[j]
    return jnp.asarray(arr)


def reference_forward(y_tokens, vocab2idx, max_seq_len, num_graphs, num_vocab):
    """Pure-numpy reference with the exact PyTorch semantics."""
    pred_list = [np.full((num_graphs, num_vocab), -1, dtype=np.int32)
                 for _ in range(max_seq_len)]
    for i in range(num_graphs):
        y = [vocab2idx[tok] for tok in y_tokens[i] if tok in vocab2idx]
        for j in range(min(max_seq_len, len(y))):
            pred_list[j][i, y[j]] = 1
    return pred_list


if __name__ == "__main__":
    # Small synthetic "batched_data".
    num_vocab = 500          # pads to 512 lanes (exercises vocab padding)
    max_seq_len = 8
    num_graphs = 16
    vocab2idx = {f"tok{k}": k for k in range(num_vocab)}

    key = jax.random.PRNGKey(0)
    kx, ky, kl = jax.random.split(key, 3)

    # batched_data.x (node features) -- unused by the forward except for device.
    x = jax.random.normal(kx, (num_graphs * 5, 4), dtype=jnp.float32)

    # batched_data.y: variable-length token sequences, some with OOV tokens and
    # some empty / longer than max_seq_len.
    tok_ids = np.asarray(
        jax.random.randint(ky, (num_graphs, max_seq_len + 2), 0, num_vocab))
    lens = np.asarray(
        jax.random.randint(kl, (num_graphs,), 0, max_seq_len + 3))
    y_tokens = []
    for i in range(num_graphs):
        toks = [f"tok{tok_ids[i, j]}" for j in range(int(lens[i]))]
        if i % 3 == 0:
            toks.append("<UNK>")  # exercises the `if tok in vocab2idx` filter
        y_tokens.append(toks)

    y_idx = tokens_to_idx(y_tokens, vocab2idx, max_seq_len)
    ref_list = reference_forward(y_tokens, vocab2idx, max_seq_len,
                                 num_graphs, num_vocab)

    # Pallas kernel path (int32 output, matching the reference values).
    pred = jax.block_until_ready(
        most_perfect_forward(y_idx, num_vocab, force_pallas=True))
    assert pred.shape == (max_seq_len, num_graphs, num_vocab)
    for j in range(max_seq_len):
        np.testing.assert_array_equal(np.asarray(pred[j]), ref_list[j])

    # int8 output variant: values are only -1/+1, 4x less HBM writeback.
    pred8 = jax.block_until_ready(
        most_perfect_forward(y_idx, num_vocab, out_dtype=jnp.int8,
                             force_pallas=True))
    for j in range(max_seq_len):
        np.testing.assert_array_equal(np.asarray(pred8[j]).astype(np.int32),
                                       ref_list[j])

    # Tiny-size fallback path (pure jnp, no Pallas launch overhead).
    small_vocab = 32
    small_v2i = {f"tok{k}": k for k in range(small_vocab)}
    small_tokens = [["tok3", "tok5", "<UNK>"], ["tok1"]]
    small_idx = tokens_to_idx(small_tokens, small_v2i, 4)
    small_pred = jax.block_until_ready(
        most_perfect_forward(small_idx, small_vocab))
    small_ref = reference_forward(small_tokens, small_v2i, 4, 2, small_vocab)
    for j in range(4):
        np.testing.assert_array_equal(np.asarray(small_pred[j]), small_ref[j])

    _ = x  # device placeholder, as in the original module
    print("KERNEL_OK")
</pallas_src>

<mosaic_0001>
module attributes {stable_mosaic.version = 11 : i64} {
  func.func @_onehot_fill_kernel(%arg0: i32, %arg1: i32, %arg2: i32, %arg3: memref<1x16x1xi32, #tpu.memory_space<vmem>>, %arg4: memref<1x16x512xi32, #tpu.memory_space<vmem>>) attributes {dimension_semantics = [#tpu.dimension_semantics<parallel>, #tpu.dimension_semantics<parallel>, #tpu.dimension_semantics<parallel>], iteration_bounds = array<i64: 8, 1, 1>, scalar_prefetch = 0 : i64, scratch_operands = 0 : i64, tpu.core_type = #tpu.core_type<tc>, window_params = [{transform_indices = @transform_0, window_bounds = array<i64: 1, 16, 1>}, {transform_indices = @transform_1, window_bounds = array<i64: 1, 16, 512>}]} {
    %c512_i32 = arith.constant 512 : i32
    %0 = arith.muli %arg2, %c512_i32 : i32
    %c0 = arith.constant 0 : index
    %c0_0 = arith.constant 0 : index
    %c0_1 = arith.constant 0 : index
    %1 = vector.load %arg3[%c0, %c0_0, %c0_1] : memref<1x16x1xi32, #tpu.memory_space<vmem>>, vector<1x16x1xi32>
    %2 = vector.broadcast %0 : i32 to vector<1x16x1xi32>
    %3 = arith.subi %1, %2 : vector<1x16x1xi32>
    %4 = tpu.iota {dimensions = array<i32: 2>} : vector<1x16x512xi32>
    %5 = vector.broadcast %3 : vector<1x16x1xi32> to vector<1x16x512xi32>
    %6 = arith.cmpi eq, %4, %5 : vector<1x16x512xi32>
    %c0_i32 = arith.constant 0 : i32
    %7 = vector.broadcast %c0_i32 : i32 to vector<1x16x1xi32>
    %8 = arith.cmpi sge, %1, %7 : vector<1x16x1xi32>
    %9 = vector.broadcast %8 : vector<1x16x1xi1> to vector<1x16x512xi1>
    %10 = arith.andi %6, %9 : vector<1x16x512xi1>
    %c1_i32 = arith.constant 1 : i32
    %c-1_i32 = arith.constant -1 : i32
    %11 = vector.broadcast %c1_i32 : i32 to vector<1x16x512xi32>
    %12 = vector.broadcast %c-1_i32 : i32 to vector<1x16x512xi32>
    %13 = arith.select %10, %11, %12 : vector<1x16x512xi1>, vector<1x16x512xi32>
    %c0_2 = arith.constant 0 : index
    %c0_3 = arith.constant 0 : index
    %c0_4 = arith.constant 0 : index
    %14 = vector.load %arg4[%c0_2, %c0_3, %c0_4] : memref<1x16x512xi32, #tpu.memory_space<vmem>>, vector<1x16x512xi32>
    tpu.vector_store %arg4[%c0_2, %c0_3, %c0_4], %13 {strides = array<i32>} : memref<1x16x512xi32, #tpu.memory_space<vmem>>, vector<1x16x512xi32>,
    return
  }
  func.func @transform_0(%arg0: i32, %arg1: i32, %arg2: i32) -> (i32, i32, i32) {
    %c0_i32 = arith.constant 0 : i32
    %c0_i32_0 = arith.constant 0 : i32
    return %arg0, %arg1, %c0_i32 : i32, i32, i32
  }
  func.func @transform_1(%arg0: i32, %arg1: i32, %arg2: i32) -> (i32, i32, i32) {
    %c0_i32 = arith.constant 0 : i32
    return %arg0, %arg1, %arg2 : i32, i32, i32
  }
}

</mosaic_0001>

<bundles_post_ra>
// kernel: tpu_custom_call.1
= control target key start
LH: loop header
LB: loop body
LE: loop exit
PB: predicated region body
PF: predicated region fallthrough
CT: control target
= control target key end

     0   :  { %6 = vsyncpa [#allocation3], 0  ;;  %s614_s0 = inlined_call_operand.vmem [shape: s32[8,16,1], index: 0, kind: input, shape index: {}]   ;;  %s615_s1 = inlined_call_operand.hbm [shape: s32[8,16,512], index: 1, kind: output, shape index: {}]  }
   0x1   :  { %8 = vsyncpa [#allocation3 + $0x1], 0  ;;  %s491_s6 = smov 0   ;;  %s493_s7 = smov 0  }
   0x2   :  { %s495_s8 = smov 0   ;;  %s497_s9 = smov 0  }
   0x3   :  { %s499_s10 = smov 0   ;;  %s501_s11 = smov 0  }
   0x4 LB: > { %s320_s12 = sadd.s32 4294967295, %s474_s11   ;;  %s321_s13 = sadd.s32 4294967294, %s474_s11   ;;  %s474_s11 = sphi %s501_s11, %s14_s11   ;;  %s470_s10 = sphi %s499_s10, %s622_s10   ;;  %s466_s9 = sphi %s497_s9, %s621_s9   ;;  %s462_s8 = sphi %s495_s8, %s620_s8   ;;  %s458_s7 = sphi %s493_s7, %s619_s7   ;;  %s454_s6 = sphi %s491_s6, %s618_s6  }
   0x5   : > { %s33_s14 = sadd.s32 1, %s470_s10  ;;  %s72_s15 = sadd.s32 1, %s462_s8 }
   0x6   : > { %p35_p0 = scmp.ge.s32.totalorder %s33_s14, 8  ;;  %p82_p1 = scmp.ne.s32.totalorder %s462_s8, %s458_s7 }
   0x7   : > { %p83_p2 = scmp.eq.s32.totalorder %s320_s12, 7  ;;  %p88_p3 = scmp.ne.s32.totalorder %s458_s7, %s454_s6 }
   0x8   : > { %s624_s14 = smov (%p35_p0, %s33_s14), 0  ;;  %p89_p5 = scmp.eq.s32.totalorder %s321_s13, 7 }
   0x9   : > { %p531_p4 = por %p83_p2, %p82_p1  ;;  %s65_s17 = ssub.s32 %s470_s10, %s624_s14 }
   0xa   : > { %p324_p6 = scmp.ge.s32.totalorder %s474_s11, 1  ;;  %p70_p7 = scmp.eq.s32.totalorder %s65_s17, 0 }
   0xb   : > { %p538_p8 = por %p89_p5, %p88_p3  ;;  %p120_p9 = scmp.lt.s32.totalorder %s474_s11, 9 }
   0xc   : > { %s544_s19 = scalar_select %p70_p7, %s462_s8, %s72_s15  }
   0xd   : > { %p121_p10 = pnand %p324_p6, %p120_p9 }
   0xe   : > { %p145_p11 = scmp.lt.s32.totalorder (!%p121_p10), %s466_s9, 7  ;;  %v476_v0 = vmov (!%p121_p10), 0   ;;  %v162_v5 = vlaneseq (!%p121_p10)  ;;  %s141_s25 = sand.u32 (!%p121_p10), 1, %s458_s7   ;;  %v477_v13 = vmov (!%p121_p10), 4294967295  }
   0xf   : > { %124 = sbr.rel (%p121_p10) target bundleno = 182 (0xb6), region = 24  ;;  %394 = vset.pattern.permute.xlu0 (!%p121_p10), %v476_v0  ;;  %395 = vset.pattern.permute.xlu1 (!%p121_p10), %v476_v0  ;;  %s325_s26 = sshll.u32 (!%p121_p10), %s141_s25, 6 }
  0x10   : > { %v163_v6 = vand.u32 (!%p121_p10), 127, %v162_v5  ;;  %s143_s27 = scalar_lea.vmem (!%p121_p10), [#allocation2], %s325_s26  ;;  %s334_s28 = sshll.u32 (!%p121_p10), %s466_s9, 10 }
  0x11   : > { %s236_s29 = sshll.u32 (!%p121_p10), %s143_s27, 4  ;;  %s561_s3 = scalar_lea.hbm (!%p121_p10), %s615_s1, %s334_s28  ;;  %s563_s29 = int_to_ptr.vmem [resolvable:$true] %s236_s29 }
  0x12   : > { %v164_v7 = vadd.s32 (!%p121_p10), 128, %v163_v6  ;;  %v165_v8 = vadd.s32 (!%p121_p10), 256, %v163_v6  ;;  %v166_v10 = vadd.s32 (!%p121_p10), 384, %v163_v6  ;;  %s568_s4 = scalar_lea.sflag (!%p121_p10), [#allocation3], %s141_s25  ;;  %s396_s5 = scalar_lea.vmem (!%p121_p10), %s563_s29, 1024 }
  0x13   : > { %p397_p12 = scmp.ne.s32.totalorder (!%p121_p10), %s563_s29, %s396_s5 }
  0x15   : > { %p398_p13 = pnand (!%p121_p10), %p397_p12, %p531_p4 }
  0x16   : > { %s146_s20 = scalar_select %p145_p11, %s466_s9, 7 }
  0x17   : > { %p399_p0 = pneg %p398_p13  ;;  %s478_s9 = smov [#allocation2]  }
  0x18   : > { %s333_s21 = sshll.u32 %s146_s20, 4  ;;  %s400_s12 = sshll.u32 %s478_s9, 4  ;;  %s401_s12 = int_to_ptr.vmem [resolvable:$false] %s400_s12 }
  0x19   : > { %s152_s24 = scalar_lea.vmem %s614_s0, %s333_s21  ;;  %s402_s13 = scalar_lea.vmem %s401_s12, 2048 }
  0x1a   : > { %v157_v1 = vld [vmem:[%s152_s24] sm:$0xff]  ;;  %v158_v2 = vld [vmem:[%s152_s24 + $0x8] sm:$0xff]  ;;  %p403_p1 = scmp.lt.s32.totalorder %s563_s29, %s401_s12  ;;  %p404_p2 = scmp.lt.s32.totalorder %s402_s13, %s396_s5 }
  0x1b   : > { %168 = vperm.xlu0 %394, %v157_v1   ;;  %vm181_vm0 = vcmp.ge.s32.totalorder %v157_v1, 0  ;;  %vm182_vm1 = vcmp.ge.s32.totalorder %v158_v2, 0 }
  0x1c   : > { %v183_v3 = vsel %vm181_vm0, 1, %v476_v0  ;;  %v184_v4 = vsel %vm182_vm1, 1, %v476_v0  ;;  %p405_p3 = por %p404_p2, %p403_p1 }
  0x1d   : > { %186 = vperm.xlu1 %395, %v183_v3  }
  0x1e   : > { %p406_p5 = pnand %p405_p3, %p399_p0 }
  0x1f   : > { %171 = vperm.xlu0 %394, %v158_v2  }
  0x21   : > { %189 = vperm.xlu1 %395, %v184_v4  }
  0x9a   : > { %v169_v9 = vpop.permute.xlu0 %168 }
  0x9b   : > { %vm173_vm2 = vcmp.eq.s32.totalorder %v163_v6, %v169_v9  ;;  %vm174_vm3 = vcmp.eq.s32.totalorder %v164_v7, %v169_v9  ;;  %vm175_vm4 = vcmp.eq.s32.totalorder %v165_v8, %v169_v9  ;;  %vm176_vm6 = vcmp.eq.s32.totalorder %v166_v10, %v169_v9 }
  0x9c   : > { %v187_v11 = vpop.permute.xlu1 %186 }
  0x9d   : > { %vm191_vm5 = vcmp.eq.s32.totalorder %v187_v11, 1 }
  0x9e   : > { %vm193_vm7 = vmand %vm173_vm2, %vm191_vm5  ;;  %v172_v12 = vpop.permute.xlu0 %171 }
  0x9f   : > { %vm194_vm8 = vmand %vm174_vm3, %vm191_vm5  ;;  %v201_v14 = vsel %vm193_vm7, 1, %v477_v13  ;;  %vm177_vm11 = vcmp.eq.s32.totalorder %v163_v6, %v172_v12  ;;  %vm178_vm13 = vcmp.eq.s32.totalorder %v164_v7, %v172_v12  ;;  %vm179_vm15 = vcmp.eq.s32.totalorder %v165_v8, %v172_v12 }
  0xa0   : > { %vm195_vm9 = vmand %vm175_vm4, %vm191_vm5  ;;  %v202_v15 = vsel %vm194_vm8, 1, %v477_v13  ;;  %209 = vst [vmem:[%s143_s27] sm:$0xff] %v201_v14  ;;  %v190_v16 = vpop.permute.xlu1 %189  ;;  %vm180_vm1 = vcmp.eq.s32.totalorder %v166_v10, %v172_v12 }
  0xa1   : > { %vm196_vm10 = vmand %vm176_vm6, %vm191_vm5  ;;  %v203_v17 = vsel %vm195_vm9, 1, %v477_v13  ;;  %210 = vst [vmem:[%s143_s27 + $0x8] sm:$0xff] %v202_v15  ;;  %vm192_vm12 = vcmp.eq.s32.totalorder %v190_v16, 1 }
  0xa2   : > { %v204_v18 = vsel %vm196_vm10, 1, %v477_v13  ;;  %211 = vst [vmem:[%s143_s27 + $0x10] sm:$0xff] %v203_v17  ;;  %vm197_vm14 = vmand %vm177_vm11, %vm192_vm12 }
  0xa3   : > { %212 = vst [vmem:[%s143_s27 + $0x18] sm:$0xff] %v204_v18  ;;  %vm198_vm0 = vmand %vm178_vm13, %vm192_vm12  ;;  %v205_v19 = vsel %vm197_vm14, 1, %v477_v13 }
  0xa4   : > { %vm199_vm2 = vmand %vm179_vm15, %vm192_vm12  ;;  %v206_v20 = vsel %vm198_vm0, 1, %v477_v13  ;;  %213 = vst [vmem:[%s143_s27 + $0x20] sm:$0xff] %v205_v19 }
  0xa5   : > { %vm200_vm3 = vmand %vm180_vm1, %vm192_vm12  ;;  %v207_v21 = vsel %vm199_vm2, 1, %v477_v13  ;;  %214 = vst [vmem:[%s143_s27 + $0x28] sm:$0xff] %v206_v20 }
  0xa6   : > { %v208_v22 = vsel %vm200_vm3, 1, %v477_v13  ;;  %215 = vst [vmem:[%s143_s27 + $0x30] sm:$0xff] %v207_v21 }
  0xa7   : > { %216 = vst [vmem:[%s143_s27 + $0x38] sm:$0xff] %v208_v22 }
  0xa8   : > { %409 = shalt.err (!%p406_p5)
}
  0xa9   : > { %s410_s15 = scalar_lea.hbm %s561_s3, 1024  ;;  %s414_s21 = scalar_lea.hbm %s615_s1, 8192 }
  0xaa   : > { %p411_p6 = scmp.ne.s32.totalorder %s561_s3, %s410_s15  ;;  %p415_p10 = scmp.lt.u32.totalorder %s561_s3, %s615_s1 }
  0xab   : > { %p416_p11 = scmp.lt.u32.totalorder %s414_s21, %s410_s15  ;;  %p418_p13 = scmp.lt.u32.totalorder %s410_s15, %s561_s3 }
  0xac   : > { %p412_p7 = pnand %p411_p6, %p531_p4 }
  0xad   : > { %p417_p12 = por %p416_p11, %p415_p10 }
  0xae   : > { %p413_p9 = pneg %p412_p7 }
  0xaf   : > { %p419_p0 = por %p418_p13, %p417_p12 }
  0xb1   : > { %p420_p1 = pnand %p419_p0, %p413_p9 }
  0xb3   : > { %423 = shalt.err (!%p420_p1)
}
  0xb4   : > { %s479_s24 = smov 512   ;;  %s480_s25 = smov 32  }
  0xb5   : > { %335 = dma.vmem_to_hbm [thread:$0]  (%p531_p4), %s563_s29, 1024, %s561_s3, %s568_s4, %s479_s24, %s479_s24, %s480_s25  }
  0xb6 PF: > { %p341_p2 = scmp.ge.s32.totalorder %s474_s11, 2  ;;  %s251_s26 = sand.u32 1, %s454_s6  }
  0xb7   : > { %s252_s27 = scalar_lea.sflag [#allocation3], %s251_s26 }
  0xb8   : > { %p338_p3 = pnand %p341_p2, %p538_p8 }
  0xba   : > { %449 = dma.done.wait (!%p338_p3), %s252_s27, 1024  }
  0xbb   : > { %451 = vsyncadd (!%p338_p3), %s252_s27, 4294966272  ;;  %s14_s11 = sadd.s32 1, %s474_s11   ;;  %s618_s6 = smov %s458_s7 }
  0xbc   : > { %p11_p5 = scmp.ge.s32.totalorder %s14_s11, 10   ;;  %s619_s7 = smov %s462_s8 }
  0xbd   : > { %s620_s8 = smov %s544_s19  ;;  %s621_s9 = smov %s470_s10 }
  0xbe   : > { %s622_s10 = smov %s624_s14  ;;  %13 = sbr.rel (!%p11_p5) target bundleno = 4 (0x4), region = 59 }
  0xc5   :  { %257 = vsyncpa [#allocation3], 1 }
  0xc6   :  { %259 = vsyncpa [#allocation3 + $0x1], 1 }

</bundles_post_ra>
